<compile_context>
chip_gen: v5e
topology: v5e:2x2
jax: 0.10.0
libtpu: 0.0.40
codegen_flags: <defaults>
</compile_context>

<pallas_src>
import functools

import jax
import jax.numpy as jnp
from jax.experimental import pallas as pl
from jax.experimental.pallas import tpu as pltpu


HIDDEN = 64          # GlobalRNN hidden size (fixed by the PyTorch module)
LANE = 128           # TPU lane width


def _round_up(x, m):
    return ((x + m - 1) // m) * m


# ----------------------------------------------------------------------------
# Kernel 1: GlobalPointNet + fused LSTM layer-0 input projection
#   conv1/2/3 (k=1, BN folded) + ReLU -> attn linear -> softmax over points
#   -> attention-weighted sum -> (attn_vec @ W_ih + b) precomputed gates
# ----------------------------------------------------------------------------
def _pointnet_kernel(x_ref, w1_ref, b1_ref, w2_ref, b2_ref, w3_ref, b3_ref,
                     wa_ref, ba_ref, wih_ref, bih_ref, gx_ref, attw_ref):
    L, N, C = x_ref.shape
    x = x_ref[...].reshape(L * N, C)          # layout-preserving (N % 8 == 0)

    # pointwise "convs" = channel matmuls (BN already folded), ReLU
    h = jnp.maximum(jnp.dot(x, w1_ref[...], preferred_element_type=jnp.float32)
                    + b1_ref[...], 0.0)
    h = jnp.maximum(jnp.dot(h, w2_ref[...], preferred_element_type=jnp.float32)
                    + b2_ref[...], 0.0)
    feat2 = jnp.maximum(jnp.dot(h, w3_ref[...], preferred_element_type=jnp.float32)
                        + b3_ref[...], 0.0)               # [L*N, Fp] (zero-padded lanes)
    feat = feat2.reshape(L, N, feat2.shape[-1])           # [L, N, Fp]

    # attention logits + softmax over the points axis
    logits = jnp.sum(feat * wa_ref[...], axis=-1) + ba_ref[...]      # [L, N]
    m = jnp.max(logits, axis=1, keepdims=True)
    e = jnp.exp(logits - m)
    s = jnp.sum(e, axis=1, keepdims=True)
    w = e * pl.reciprocal(s, approx=True)                 # EUP reciprocal
    attw_ref[...] = w[None]                               # [1, L, N]

    vec = jnp.sum(feat * w[:, :, None], axis=1)           # [L, Fp]

    # hoisted LSTM layer-0 input projection: one well-shaped matmul for all
    # timesteps of this batch element (biases b_ih + b_hh folded in).
    gx = jnp.dot(vec, wih_ref[...], preferred_element_type=jnp.float32) + bih_ref[...]
    gx_ref[...] = gx[None]                                # [1, L, 4*Hp]  (lane-dense)


def _pointnet_call(x, weights, B, L, N, C, gate_width):
    w_specs = [pl.BlockSpec(w.shape, lambda b: (0, 0)) for w in weights]
    return pl.pallas_call(
        _pointnet_kernel,
        grid=(B,),
        in_specs=[pl.BlockSpec((L, N, C), lambda b: (b, 0, 0))] + w_specs,
        out_specs=[pl.BlockSpec((1, L, gate_width), lambda b: (b, 0, 0)),
                   pl.BlockSpec((1, L, N), lambda b: (b, 0, 0))],
        out_shape=(jax.ShapeDtypeStruct((B, L, gate_width), jnp.float32),
                   jax.ShapeDtypeStruct((B, L, N), jnp.float32)),
        compiler_params=pltpu.CompilerParams(dimension_semantics=("parallel",)),
    )(x, *weights)


# ----------------------------------------------------------------------------
# Kernel 2: single-layer LSTM (gate order i, f, g, o) + fused fc1/ReLU/fc2 head.
# Single invocation; the whole (short) time loop is statically unrolled so the
# only serial work per step is one small h @ W_hh matmul + gate math.
# ----------------------------------------------------------------------------
def _lstm_head_kernel(gx_ref, h0_ref, c0_ref, whh_ref, w1_ref, b1_ref,
                      w2_ref, b2_ref, gvec_ref, gloc_ref, hn_ref, cn_ref,
                      *, gx_time_major):
    Hp = h0_ref.shape[-1]
    gx = gx_ref[...]                         # precomputed x@W_ih + b, all steps
    whh = whh_ref[...]
    w1 = w1_ref[...]
    b1 = b1_ref[...]
    w2 = w2_ref[...]
    b2 = b2_ref[...]
    h = h0_ref[...]                          # [B, Hp] (padded lanes are zero)
    c = c0_ref[...]
    L = gx.shape[0] if gx_time_major else gx.shape[1]

    # L is a small compile-time constant -> full static unroll.  For long
    # sequences switch to lax.fori_loop(..., unroll=True) / a pipelined grid.
    for t in range(L):
        gx_t = gx[t] if gx_time_major else gx[:, t, :]            # [B, 4*Hp]
        gates = gx_t + jnp.dot(h, whh, preferred_element_type=jnp.float32)
        # Each gate block is 128-lane aligned (weights reordered/padded in the
        # wrapper) -> no sub-vreg lane slicing on the serial critical path.
        i = jax.nn.sigmoid(gates[:, 0 * Hp:1 * Hp])
        f = jax.nn.sigmoid(gates[:, 1 * Hp:2 * Hp])
        g = jnp.tanh(gates[:, 2 * Hp:3 * Hp])
        o = jax.nn.sigmoid(gates[:, 3 * Hp:4 * Hp])
        c = f * c + i * g
        h = o * jnp.tanh(c)
        gvec_ref[t] = h                                           # [B, Hp]

        # fused fc1 -> ReLU -> fc2 head (off the recurrence critical path)
        z = jnp.maximum(jnp.dot(h, w1, preferred_element_type=jnp.float32) + b1, 0.0)
        gloc_ref[t] = jnp.dot(z, w2, preferred_element_type=jnp.float32) + b2

    hn_ref[...] = h
    cn_ref[...] = c


def _lstm_head_call(gx, h0p, c0p, whhp, w1p, b1h, w2p, b2p, *, L, B, Hp, Dp,
                    gx_time_major):
    kern = functools.partial(_lstm_head_kernel, gx_time_major=gx_time_major)
    return pl.pallas_call(
        kern,
        out_shape=(jax.ShapeDtypeStruct((L, B, Hp), jnp.float32),   # g_vec (padded)
                   jax.ShapeDtypeStruct((L, B, Dp), jnp.float32),   # g_loc (padded)
                   jax.ShapeDtypeStruct((B, Hp), jnp.float32),      # hn (padded)
                   jax.ShapeDtypeStruct((B, Hp), jnp.float32)),     # cn (padded)
    )(gx, h0p, c0p, whhp, w1p, b1h, w2p, b2p)


# ----------------------------------------------------------------------------
# Kernel 3: input projection for LSTM layers >= 1 (only used if num_layers > 1)
# ----------------------------------------------------------------------------
def _proj_kernel(x_ref, w_ref, b_ref, o_ref):
    o_ref[...] = (jnp.dot(x_ref[...], w_ref[...], preferred_element_type=jnp.float32)
                  + b_ref[...])


def _proj_call(x2d, w, b):
    return pl.pallas_call(
        _proj_kernel,
        out_shape=jax.ShapeDtypeStruct((x2d.shape[0], w.shape[1]), jnp.float32),
    )(x2d, w, b)


# ----------------------------------------------------------------------------
# Wrapper-side weight preparation
# ----------------------------------------------------------------------------
def _fold_bn(w, b, gamma, beta, mean, var, eps=1e-5):
    scale = gamma / jnp.sqrt(var + eps)
    w_f = (w * scale[:, None]).T                      # [C_in, C_out]
    b_f = ((b - mean) * scale + beta)[None, :]        # [1, C_out]
    return w_f, b_f


def _pad_to(a, shape):
    return jnp.pad(a, [(0, s - d) for d, s in zip(a.shape, shape)])


def _pad_gate_cols(w_t, rows_pad, h, hp):
    """[I, 4h] -> [rows_pad, 4*hp]; gate k's columns placed at k*hp .. k*hp+h."""
    out = jnp.zeros((rows_pad, 4 * hp), w_t.dtype)
    for k in range(4):
        out = out.at[:w_t.shape[0], k * hp:k * hp + h].set(w_t[:, k * h:(k + 1) * h])
    return out


def _pad_gate_bias(bvec, h, hp):
    out = jnp.zeros((1, 4 * hp), bvec.dtype)
    for k in range(4):
        out = out.at[0, k * hp:k * hp + h].set(bvec[k * h:(k + 1) * h])
    return out


# ----------------------------------------------------------------------------
# Full GlobalModule forward
# ----------------------------------------------------------------------------
def global_module_forward(x, h0, c0, batch_size, length_size, cfg, params):
    """
    x:  [batch_size * length_size, N_points, C_in]   (rows ordered b-major)
    h0, c0: [num_layers, batch_size, 64]
    returns (g_vec [B,L,64], g_loc [B,L,2], attn_weights [B*L,N,1],
             hn [num_layers,B,64], cn [num_layers,B,64])
    """
    B, L = batch_size, length_size
    _, N, C = x.shape
    F = cfg["out_feature_GlobalModule"]
    H = HIDDEN
    Fp = _round_up(F, LANE)
    Hp = _round_up(H, LANE)
    Dp = LANE
    num_layers = cfg["numlayers_RNN"]

    # fold BN into the k=1 convs; pad the feature dim for lane-dense stores
    w1, b1 = _fold_bn(params["conv1_w"], params["conv1_b"], params["bn1_gamma"],
                      params["bn1_beta"], params["bn1_mean"], params["bn1_var"])
    w2, b2 = _fold_bn(params["conv2_w"], params["conv2_b"], params["bn2_gamma"],
                      params["bn2_beta"], params["bn2_mean"], params["bn2_var"])
    w3, b3 = _fold_bn(params["conv3_w"], params["conv3_b"], params["bn3_gamma"],
                      params["bn3_beta"], params["bn3_mean"], params["bn3_var"])
    w3p = _pad_to(w3, (w3.shape[0], Fp))
    b3p = _pad_to(b3, (1, Fp))
    wap = _pad_to(params["attn_w"], (1, Fp))
    ba = params["attn_b"].reshape(1, 1)

    # LSTM layer-0 input projection, fused into the PointNet kernel
    l0 = params["lstm"][0]
    wih0 = _pad_gate_cols(l0["w_ih"].T, Fp, H, Hp)               # [Fp, 4Hp]
    bih0 = _pad_gate_bias(l0["b_ih"] + l0["b_hh"], H, Hp)        # [1, 4Hp]

    gx, attw = _pointnet_call(
        x, (w1, b1, w2, b2, w3p, b3p, wap, ba, wih0, bih0),
        B, L, N, C, 4 * Hp)                                      # gx: [B, L, 4Hp]

    # head weights (zero-padded so kernel stores stay 128-lane dense)
    w1p = _pad_to(params["fc1_w"].T, (Hp, params["fc1_w"].shape[0]))   # [Hp, 16]
    b1h = params["fc1_b"][None, :]
    w2p = _pad_to(params["fc2_w"].T, (params["fc2_w"].shape[1], Dp))   # [16, Dp]
    b2p = _pad_to(params["fc2_b"][None, :], (1, Dp))

    hns, cns = [], []
    gx_time_major = False
    gvec_pad = gloc_pad = None
    for layer in range(num_layers):
        lp = params["lstm"][layer]
        whhp = _pad_gate_cols(lp["w_hh"].T, Hp, H, Hp)           # [Hp, 4Hp]
        h0p = _pad_to(h0[layer], (B, Hp))
        c0p = _pad_to(c0[layer], (B, Hp))
        gvec_pad, gloc_pad, hn_pad, cn_pad = _lstm_head_call(
            gx, h0p, c0p, whhp, w1p, b1h, w2p, b2p,
            L=L, B=B, Hp=Hp, Dp=Dp, gx_time_major=gx_time_major)
        hns.append(hn_pad[:, :H])
        cns.append(cn_pad[:, :H])
        if layer + 1 < num_layers:
            # TODO(synk): inter-layer dropout (training-only) not implemented.
            nxt = params["lstm"][layer + 1]
            wihp = _pad_gate_cols(nxt["w_ih"].T, Hp, H, Hp)
            bihp = _pad_gate_bias(nxt["b_ih"] + nxt["b_hh"], H, Hp)
            gx = _proj_call(gvec_pad.reshape(L * B, Hp), wihp,
                            bihp).reshape(L, B, 4 * Hp)
            gx_time_major = True

    g_vec = jnp.transpose(gvec_pad, (1, 0, 2))[:, :, :H]          # [B, L, 64]
    g_loc = jnp.transpose(gloc_pad, (1, 0, 2))[:, :, :2]          # [B, L, 2]
    attn_weights = attw.reshape(B * L, N)[:, :, None]             # [B*L, N, 1]
    hn = jnp.stack(hns, axis=0)
    cn = jnp.stack(cns, axis=0)
    return g_vec, g_loc, attn_weights, hn, cn


# ----------------------------------------------------------------------------
# Deterministic parameter init (synthetic; mirrors the PyTorch shapes)
# ----------------------------------------------------------------------------
def init_params(key, cfg):
    c_in = cfg["out_feauture_BaseModule"] + cfg["coordinate_feature"]
    F = cfg["out_feature_GlobalModule"]
    hidden = HIDDEN
    keys = iter(jax.random.split(key, 64))

    def nrm(shape, s=0.1):
        return s * jax.random.normal(next(keys), shape, jnp.float32)

    p = {}
    for name, (co, ci) in [("conv1", (32, c_in)), ("conv2", (48, 32)),
                           ("conv3", (F, 48))]:
        p[name + "_w"] = nrm((co, ci))
        p[name + "_b"] = nrm((co,))
    for i, co in zip(("1", "2", "3"), (32, 48, F)):
        p["bn" + i + "_gamma"] = 1.0 + nrm((co,), 0.05)
        p["bn" + i + "_beta"] = nrm((co,), 0.05)
        p["bn" + i + "_mean"] = nrm((co,), 0.05)
        p["bn" + i + "_var"] = 1.0 + jnp.abs(nrm((co,), 0.05))
    p["attn_w"] = nrm((1, F))
    p["attn_b"] = nrm((1,))

    p["lstm"] = []
    for l in range(cfg["numlayers_RNN"]):
        isz = F if l == 0 else hidden
        p["lstm"].append({
            "w_ih": nrm((4 * hidden, isz)),
            "w_hh": nrm((4 * hidden, hidden)),
            "b_ih": nrm((4 * hidden,)),
            "b_hh": nrm((4 * hidden,)),
        })

    p["fc1_w"] = nrm((16, hidden))
    p["fc1_b"] = nrm((16,))
    p["fc2_w"] = nrm((2, 16))
    p["fc2_b"] = nrm((2,))
    return p


if __name__ == "__main__":
    cfg = dict(
        out_feauture_BaseModule=6,
        coordinate_feature=2,
        out_feature_GlobalModule=16,
        numlayers_RNN=1,
        dropout_RNN=0.0,
    )
    B, L, N_points = 2, 4, 16
    C_in = cfg["out_feauture_BaseModule"] + cfg["coordinate_feature"]

    key = jax.random.PRNGKey(0)
    kp, kx, kh, kc = jax.random.split(key, 4)
    params = init_params(kp, cfg)

    x = jax.random.normal(kx, (B * L, N_points, C_in), jnp.float32)
    h0 = 0.1 * jax.random.normal(kh, (cfg["numlayers_RNN"], B, HIDDEN), jnp.float32)
    c0 = 0.1 * jax.random.normal(kc, (cfg["numlayers_RNN"], B, HIDDEN), jnp.float32)

    g_vec, g_loc, attn_weights, hn, cn = global_module_forward(
        x, h0, c0, B, L, cfg, params)
    jax.block_until_ready((g_vec, g_loc, attn_weights, hn, cn))

    assert g_vec.shape == (B, L, HIDDEN)
    assert g_loc.shape == (B, L, 2)
    assert attn_weights.shape == (B * L, N_points, 1)
    assert hn.shape == (cfg["numlayers_RNN"], B, HIDDEN)
    assert cn.shape == (cfg["numlayers_RNN"], B, HIDDEN)
    # softmax sanity: attention weights sum to ~1 over the points axis
    # (approx-reciprocal denominator -> allow a small tolerance)
    s = jnp.sum(attn_weights[..., 0], axis=1)
    assert bool(jnp.all(jnp.abs(s - 1.0) < 5e-3))
    assert bool(jnp.all(jnp.isfinite(g_loc)))
    assert bool(jnp.all(jnp.isfinite(g_vec)))

    print("KERNEL_OK")
</pallas_src>

<mosaic_0001>
module attributes {stable_mosaic.version = 11 : i64} {
  func.func @_pointnet_kernel(%arg0: i32, %arg1: memref<4x16x8xf32, #tpu.memory_space<vmem>>, %arg2: memref<8x32xf32, #tpu.memory_space<vmem>>, %arg3: memref<1x32xf32, #tpu.memory_space<vmem>>, %arg4: memref<32x48xf32, #tpu.memory_space<vmem>>, %arg5: memref<1x48xf32, #tpu.memory_space<vmem>>, %arg6: memref<48x128xf32, #tpu.memory_space<vmem>>, %arg7: memref<1x128xf32, #tpu.memory_space<vmem>>, %arg8: memref<1x128xf32, #tpu.memory_space<vmem>>, %arg9: memref<1x1xf32, #tpu.memory_space<vmem>>, %arg10: memref<128x512xf32, #tpu.memory_space<vmem>>, %arg11: memref<1x512xf32, #tpu.memory_space<vmem>>, %arg12: memref<1x4x512xf32, #tpu.memory_space<vmem>>, %arg13: memref<1x4x16xf32, #tpu.memory_space<vmem>>) attributes {dimension_semantics = [#tpu.dimension_semantics<parallel>], iteration_bounds = array<i64: 2>, scalar_prefetch = 0 : i64, scratch_operands = 0 : i64, tpu.core_type = #tpu.core_type<tc>, window_params = [{transform_indices = @transform_0, window_bounds = array<i64: 4, 16, 8>}, {pipeline_mode = #tpu.pipeline_mode<synchronous>, transform_indices = @transform_1, window_bounds = array<i64: 8, 32>}, {pipeline_mode = #tpu.pipeline_mode<synchronous>, transform_indices = @transform_2, window_bounds = array<i64: 1, 32>}, {pipeline_mode = #tpu.pipeline_mode<synchronous>, transform_indices = @transform_3, window_bounds = array<i64: 32, 48>}, {pipeline_mode = #tpu.pipeline_mode<synchronous>, transform_indices = @transform_4, window_bounds = array<i64: 1, 48>}, {pipeline_mode = #tpu.pipeline_mode<synchronous>, transform_indices = @transform_5, window_bounds = array<i64: 48, 128>}, {pipeline_mode = #tpu.pipeline_mode<synchronous>, transform_indices = @transform_6, window_bounds = array<i64: 1, 128>}, {pipeline_mode = #tpu.pipeline_mode<synchronous>, transform_indices = @transform_7, window_bounds = array<i64: 1, 128>}, {pipeline_mode = #tpu.pipeline_mode<synchronous>, transform_indices = @transform_8, window_bounds = array<i64: 1, 1>}, {pipeline_mode = #tpu.pipeline_mode<synchronous>, transform_indices = @transform_9, window_bounds = array<i64: 128, 512>}, {pipeline_mode = #tpu.pipeline_mode<synchronous>, transform_indices = @transform_10, window_bounds = array<i64: 1, 512>}, {transform_indices = @transform_11, window_bounds = array<i64: 1, 4, 512>}, {transform_indices = @transform_12, window_bounds = array<i64: 1, 4, 16>}]} {
    %c0 = arith.constant 0 : index
    %c0_0 = arith.constant 0 : index
    %c0_1 = arith.constant 0 : index
    %0 = vector.load %arg1[%c0, %c0_0, %c0_1] : memref<4x16x8xf32, #tpu.memory_space<vmem>>, vector<4x16x8xf32>
    %1 = vector.shape_cast %0 : vector<4x16x8xf32> to vector<64x8xf32>
    %c0_2 = arith.constant 0 : index
    %c0_3 = arith.constant 0 : index
    %2 = vector.load %arg2[%c0_2, %c0_3] : memref<8x32xf32, #tpu.memory_space<vmem>>, vector<8x32xf32>
    %cst = arith.constant dense<0.000000e+00> : vector<64x32xf32>
    %3 = tpu.matmul %1, %2, %cst {dimension_numbers = #tpu.dot_dimension_numbers<[1], [0], [0], [1], [0, 0, 1, 1], [], []>} : vector<64x8xf32>, vector<8x32xf32>, vector<64x32xf32> -> vector<64x32xf32>
    %c0_4 = arith.constant 0 : index
    %c0_5 = arith.constant 0 : index
    %4 = vector.load %arg3[%c0_4, %c0_5] : memref<1x32xf32, #tpu.memory_space<vmem>>, vector<1x32xf32>
    %5 = vector.broadcast %4 : vector<1x32xf32> to vector<64x32xf32>
    %6 = arith.addf %3, %5 : vector<64x32xf32>
    %cst_6 = arith.constant 0.000000e+00 : f32
    %7 = vector.broadcast %cst_6 : f32 to vector<64x32xf32>
    %8 = arith.maximumf %6, %7 : vector<64x32xf32>
    %c0_7 = arith.constant 0 : index
    %c0_8 = arith.constant 0 : index
    %9 = vector.load %arg4[%c0_7, %c0_8] : memref<32x48xf32, #tpu.memory_space<vmem>>, vector<32x48xf32>
    %cst_9 = arith.constant dense<0.000000e+00> : vector<64x48xf32>
    %10 = tpu.matmul %8, %9, %cst_9 {dimension_numbers = #tpu.dot_dimension_numbers<[1], [0], [0], [1], [0, 0, 1, 1], [], []>} : vector<64x32xf32>, vector<32x48xf32>, vector<64x48xf32> -> vector<64x48xf32>
    %c0_10 = arith.constant 0 : index
    %c0_11 = arith.constant 0 : index
    %11 = vector.load %arg5[%c0_10, %c0_11] : memref<1x48xf32, #tpu.memory_space<vmem>>, vector<1x48xf32>
    %12 = vector.broadcast %11 : vector<1x48xf32> to vector<64x48xf32>
    %13 = arith.addf %10, %12 : vector<64x48xf32>
    %cst_12 = arith.constant 0.000000e+00 : f32
    %14 = vector.broadcast %cst_12 : f32 to vector<64x48xf32>
    %15 = arith.maximumf %13, %14 : vector<64x48xf32>
    %c0_13 = arith.constant 0 : index
    %c0_14 = arith.constant 0 : index
    %16 = vector.load %arg6[%c0_13, %c0_14] : memref<48x128xf32, #tpu.memory_space<vmem>>, vector<48x128xf32>
    %cst_15 = arith.constant dense<0.000000e+00> : vector<64x128xf32>
    %17 = tpu.matmul %15, %16, %cst_15 {dimension_numbers = #tpu.dot_dimension_numbers<[1], [0], [0], [1], [0, 0, 1, 1], [], []>} : vector<64x48xf32>, vector<48x128xf32>, vector<64x128xf32> -> vector<64x128xf32>
    %c0_16 = arith.constant 0 : index
    %c0_17 = arith.constant 0 : index
    %18 = vector.load %arg7[%c0_16, %c0_17] : memref<1x128xf32, #tpu.memory_space<vmem>>, vector<1x128xf32>
    %19 = vector.broadcast %18 : vector<1x128xf32> to vector<64x128xf32>
    %20 = arith.addf %17, %19 : vector<64x128xf32>
    %cst_18 = arith.constant 0.000000e+00 : f32
    %21 = vector.broadcast %cst_18 : f32 to vector<64x128xf32>
    %22 = arith.maximumf %20, %21 : vector<64x128xf32>
    %23 = vector.shape_cast %22 : vector<64x128xf32> to vector<4x16x128xf32>
    %c0_19 = arith.constant 0 : index
    %c0_20 = arith.constant 0 : index
    %24 = vector.load %arg8[%c0_19, %c0_20] : memref<1x128xf32, #tpu.memory_space<vmem>>, vector<1x128xf32>
    %25 = vector.shape_cast %24 : vector<1x128xf32> to vector<1x1x128xf32>
    %26 = vector.broadcast %25 : vector<1x1x128xf32> to vector<4x16x128xf32>
    %27 = arith.mulf %23, %26 : vector<4x16x128xf32>
    %cst_21 = arith.constant dense<0.000000e+00> : vector<4x16xf32>
    %28 = vector.multi_reduction <add>, %27, %cst_21 [2] : vector<4x16x128xf32> to vector<4x16xf32>
    %c0_22 = arith.constant 0 : index
    %c0_23 = arith.constant 0 : index
    %29 = vector.load %arg9[%c0_22, %c0_23] : memref<1x1xf32, #tpu.memory_space<vmem>>, vector<1x1xf32>
    %30 = vector.broadcast %29 : vector<1x1xf32> to vector<4x16xf32>
    %31 = arith.addf %28, %30 : vector<4x16xf32>
    %cst_24 = arith.constant dense<0xFF800000> : vector<4xf32>
    %32 = vector.multi_reduction <maximumf>, %31, %cst_24 [1] : vector<4x16xf32> to vector<4xf32>
    %33 = vector.shape_cast %32 : vector<4xf32> to vector<4x1xf32>
    %34 = vector.broadcast %33 : vector<4x1xf32> to vector<4x16xf32>
    %35 = arith.subf %31, %34 : vector<4x16xf32>
    %36 = math.exp %35 : vector<4x16xf32>
    %cst_25 = arith.constant dense<0.000000e+00> : vector<4xf32>
    %37 = vector.multi_reduction <add>, %36, %cst_25 [1] : vector<4x16xf32> to vector<4xf32>
    %38 = vector.shape_cast %37 : vector<4xf32> to vector<4x1xf32>
    %39 = tpu.reciprocal %38 {approx = true} : vector<4x1xf32> -> vector<4x1xf32>
    %40 = vector.broadcast %39 : vector<4x1xf32> to vector<4x16xf32>
    %41 = arith.mulf %36, %40 : vector<4x16xf32>
    %42 = vector.shape_cast %41 : vector<4x16xf32> to vector<1x4x16xf32>
    %c0_26 = arith.constant 0 : index
    %c0_27 = arith.constant 0 : index
    %c0_28 = arith.constant 0 : index
    %43 = vector.load %arg13[%c0_26, %c0_27, %c0_28] : memref<1x4x16xf32, #tpu.memory_space<vmem>>, vector<1x4x16xf32>
    tpu.vector_store %arg13[%c0_26, %c0_27, %c0_28], %42 {strides = array<i32>} : memref<1x4x16xf32, #tpu.memory_space<vmem>>, vector<1x4x16xf32>,
    %44 = vector.shape_cast %41 : vector<4x16xf32> to vector<4x16x1xf32>
    %45 = vector.broadcast %44 : vector<4x16x1xf32> to vector<4x16x128xf32>
    %46 = arith.mulf %23, %45 : vector<4x16x128xf32>
    %cst_29 = arith.constant dense<0.000000e+00> : vector<4x128xf32>
    %47 = vector.multi_reduction <add>, %46, %cst_29 [1] : vector<4x16x128xf32> to vector<4x128xf32>
    %c0_30 = arith.constant 0 : index
    %c0_31 = arith.constant 0 : index
    %48 = vector.load %arg10[%c0_30, %c0_31] : memref<128x512xf32, #tpu.memory_space<vmem>>, vector<128x512xf32>
    %cst_32 = arith.constant dense<0.000000e+00> : vector<4x512xf32>
    %49 = tpu.matmul %47, %48, %cst_32 {dimension_numbers = #tpu.dot_dimension_numbers<[1], [0], [0], [1], [0, 0, 1, 1], [], []>} : vector<4x128xf32>, vector<128x512xf32>, vector<4x512xf32> -> vector<4x512xf32>
    %c0_33 = arith.constant 0 : index
    %c0_34 = arith.constant 0 : index
    %50 = vector.load %arg11[%c0_33, %c0_34] : memref<1x512xf32, #tpu.memory_space<vmem>>, vector<1x512xf32>
    %51 = vector.broadcast %50 : vector<1x512xf32> to vector<4x512xf32>
    %52 = arith.addf %49, %51 : vector<4x512xf32>
    %53 = vector.shape_cast %52 : vector<4x512xf32> to vector<1x4x512xf32>
    %c0_35 = arith.constant 0 : index
    %c0_36 = arith.constant 0 : index
    %c0_37 = arith.constant 0 : index
    %54 = vector.load %arg12[%c0_35, %c0_36, %c0_37] : memref<1x4x512xf32, #tpu.memory_space<vmem>>, vector<1x4x512xf32>
    tpu.vector_store %arg12[%c0_35, %c0_36, %c0_37], %53 {strides = array<i32>} : memref<1x4x512xf32, #tpu.memory_space<vmem>>, vector<1x4x512xf32>,
    return
  }
  func.func @transform_0(%arg0: i32) -> (i32, i32, i32) {
    %c0_i32 = arith.constant 0 : i32
    %c0_i32_0 = arith.constant 0 : i32
    %c0_i32_1 = arith.constant 0 : i32
    return %arg0, %c0_i32, %c0_i32_0 : i32, i32, i32
  }
  func.func @transform_1(%arg0: i32) -> (i32, i32) {
    %c0_i32 = arith.constant 0 : i32
    %c0_i32_0 = arith.constant 0 : i32
    %c0_i32_1 = arith.constant 0 : i32
    return %c0_i32, %c0_i32_0 : i32, i32
  }
  func.func @transform_2(%arg0: i32) -> (i32, i32) {
    %c0_i32 = arith.constant 0 : i32
    %c0_i32_0 = arith.constant 0 : i32
    %c0_i32_1 = arith.constant 0 : i32
    return %c0_i32, %c0_i32_0 : i32, i32
  }
  func.func @transform_3(%arg0: i32) -> (i32, i32) {
    %c0_i32 = arith.constant 0 : i32
    %c0_i32_0 = arith.constant 0 : i32
    %c0_i32_1 = arith.constant 0 : i32
    return %c0_i32, %c0_i32_0 : i32, i32
  }
  func.func @transform_4(%arg0: i32) -> (i32, i32) {
    %c0_i32 = arith.constant 0 : i32
    %c0_i32_0 = arith.constant 0 : i32
    %c0_i32_1 = arith.constant 0 : i32
    return %c0_i32, %c0_i32_0 : i32, i32
  }
  func.func @transform_5(%arg0: i32) -> (i32, i32) {
    %c0_i32 = arith.constant 0 : i32
    %c0_i32_0 = arith.constant 0 : i32
    %c0_i32_1 = arith.constant 0 : i32
    return %c0_i32, %c0_i32_0 : i32, i32
  }
  func.func @transform_6(%arg0: i32) -> (i32, i32) {
    %c0_i32 = arith.constant 0 : i32
    %c0_i32_0 = arith.constant 0 : i32
    %c0_i32_1 = arith.constant 0 : i32
    return %c0_i32, %c0_i32_0 : i32, i32
  }
  func.func @transform_7(%arg0: i32) -> (i32, i32) {
    %c0_i32 = arith.constant 0 : i32
    %c0_i32_0 = arith.constant 0 : i32
    %c0_i32_1 = arith.constant 0 : i32
    return %c0_i32, %c0_i32_0 : i32, i32
  }
  func.func @transform_8(%arg0: i32) -> (i32, i32) {
    %c0_i32 = arith.constant 0 : i32
    %c0_i32_0 = arith.constant 0 : i32
    %c0_i32_1 = arith.constant 0 : i32
    return %c0_i32, %c0_i32_0 : i32, i32
  }
  func.func @transform_9(%arg0: i32) -> (i32, i32) {
    %c0_i32 = arith.constant 0 : i32
    %c0_i32_0 = arith.constant 0 : i32
    %c0_i32_1 = arith.constant 0 : i32
    return %c0_i32, %c0_i32_0 : i32, i32
  }
  func.func @transform_10(%arg0: i32) -> (i32, i32) {
    %c0_i32 = arith.constant 0 : i32
    %c0_i32_0 = arith.constant 0 : i32
    %c0_i32_1 = arith.constant 0 : i32
    return %c0_i32, %c0_i32_0 : i32, i32
  }
  func.func @transform_11(%arg0: i32) -> (i32, i32, i32) {
    %c0_i32 = arith.constant 0 : i32
    %c0_i32_0 = arith.constant 0 : i32
    %c0_i32_1 = arith.constant 0 : i32
    return %arg0, %c0_i32, %c0_i32_0 : i32, i32, i32
  }
  func.func @transform_12(%arg0: i32) -> (i32, i32, i32) {
    %c0_i32 = arith.constant 0 : i32
    %c0_i32_0 = arith.constant 0 : i32
    %c0_i32_1 = arith.constant 0 : i32
    return %arg0, %c0_i32, %c0_i32_0 : i32, i32, i32
  }
}

</mosaic_0001>

<bundles_post_ra>
// kernel: tpu_custom_call.1
= control target key start
LH: loop header
LB: loop body
LE: loop exit
PB: predicated region body
PF: predicated region fallthrough
CT: control target
= control target key end

     0   :  { %s1934_s0 = inlined_call_operand.vmem [shape: f32[8,16,8], index: 0, kind: input, shape index: {}]   ;;  %s1935_s1 = inlined_call_operand.vmem [shape: f32[8,32], index: 1, kind: input, shape index: {}]   ;;  %s1936_s2 = inlined_call_operand.vmem [shape: f32[1,32], index: 2, kind: input, shape index: {}]   ;;  %s1937_s3 = inlined_call_operand.vmem [shape: f32[32,48], index: 3, kind: input, shape index: {}]   ;;  %s1938_s4 = inlined_call_operand.vmem [shape: f32[1,48], index: 4, kind: input, shape index: {}]   ;;  %s1939_s5 = inlined_call_operand.vmem [shape: f32[48,128], index: 5, kind: input, shape index: {}]   ;;  %s1940_s6 = inlined_call_operand.vmem [shape: f32[1,128], index: 6, kind: input, shape index: {}]   ;;  %s1941_s7 = inlined_call_operand.vmem [shape: f32[1,128], index: 7, kind: input, shape index: {}]   ;;  %s1942_s8 = inlined_call_operand.<no memory space> [shape: f32[1,1], index: 8, kind: input, shape index: {}]   ;;  %s1943_s9 = inlined_call_operand.hbm [shape: f32[128,512], index: 9, kind: input, shape index: {}]   ;;  %s1944_s10 = inlined_call_operand.vmem [shape: f32[1,512], index: 10, kind: input, shape index: {}]   ;;  %s1945_s11 = inlined_call_operand.hbm [shape: f32[2,4,512], index: 11, kind: output, shape index: {0}]   ;;  %s1946_s12 = inlined_call_operand.hbm [shape: f32[2,4,16], index: 12, kind: output, shape index: {1}]  }
   0x1   :  { %1947 = sst [smem:[#allocation12_spill]] %s1934_s0  ;;  %v18_v0 = vstv %s1942_s8 }
   0x2   :  { %1948 = sst [smem:[#allocation13_spill]] %s1935_s1  ;;  %19 = vst [vmem:[#allocation2] sm:$0x1] %v18_v0 }
   0x3   :  { %1949 = sst [smem:[#allocation14_spill]] %s1936_s2 }
   0x4   :  { %1950 = sst [smem:[#allocation15_spill]] %s1937_s3 }
   0x5   :  { %1951 = sst [smem:[#allocation16_spill]] %s1938_s4 }
   0x6   :  { %1952 = sst [smem:[#allocation17_spill]] %s1939_s5 }
   0x7   :  { %20 = vsyncpa [#allocation4], 0 }
   0x8   :  { %21 = vsyncpa [#allocation5], 0 }
   0x9   :  { %23 = vsyncpa [#allocation5 + $0x1], 0 }
   0xa   :  { %24 = vsyncpa [#allocation8], 0 }
   0xb   :  { %26 = vsyncpa [#allocation8 + $0x1], 0  ;;  %s1618_s23 = smov 0   ;;  %s1620_s24 = smov 0  }
   0xc   :  { %s1622_s25 = smov 0   ;;  %s1624_s26 = smov 0  }
   0xd LB: > { %s1639_s8 = sadd.s32 4294967295, %s1544_s26   ;;  %s1288_s27 = sadd.s32 4294967294, %s1544_s26   ;;  %s1544_s26 = sphi %s1624_s26, %s1964_s26   ;;  %s1540_s25 = sphi %s1622_s25, %s1963_s25   ;;  %s1536_s24 = sphi %s1620_s24, %s1962_s24   ;;  %s1532_s23 = sphi %s1618_s23, %s1961_s23  }
   0xe   : > { %s1643_s28 = sadd.s32 1, %s1544_s26   ;;  %s275_s29 = sadd.s32 1, %s1540_s25 }
   0xf   : > { %s272_s30 = ssub.s32 %s1544_s26, %s1643_s28  ;;  %p285_p0 = scmp.ne.s32.totalorder %s1540_s25, %s1536_s24 }
  0x10   : > { %p273_p1 = scmp.eq.s32.totalorder %s272_s30, 0  ;;  %p286_p2 = scmp.eq.s32.totalorder %s1639_s8, 1 }
  0x11   : > { %p291_p3 = scmp.ne.s32.totalorder %s1536_s24, %s1532_s23  ;;  %p292_p4 = scmp.eq.s32.totalorder %s1288_s27, 1 }
  0x12   : > { %s1654_s13 = scalar_select %p273_p1, %s1540_s25, %s275_s29  }
  0x13   : > { %p1656_p5 = por %p286_p2, %p285_p0  ;;  %p1660_p6 = por %p292_p4, %p291_p3 }
  0x14   : > { %p1289_p7 = scmp.ge.s32.totalorder %s1544_s26, 1  ;;  %p325_p8 = scmp.lt.s32.totalorder %s1544_s26, 3 }
  0x15   : > { %p1351_p9 = scmp.eq.s32.totalorder %s1639_s8, 0  ;;  %s360_s18 = sshll.u32 %s1943_s9, 4  ;;  %s361_s18 = int_to_ptr.hbm [resolvable:$true] %s360_s18 }
  0x16   : > { %p326_p10 = pnand %p1289_p7, %p325_p8  ;;  %s1546_s19 = smov [#allocation3]  }
  0x17   : > { %s362_s20 = sshll.u32 %s1546_s19, 4  ;;  %s1547_s21 = smov 512   ;;  %s363_s20 = int_to_ptr.vmem [resolvable:$true] %s362_s20 }
  0x18   : > { %p1340_p11 = pneg %p326_p10  ;;  %s1548_s22 = smov 32  }
  0x19   : > { %391 = sbr.rel (%p326_p10) target bundleno = 1307 (0x51b), region = 64 }
  0x1a   : > { %p1341_p12 = pnand %p1351_p9, %p1340_p11 }
  0x1c   : > { %1343 = dma.hbm_to_vmem [thread:$0]  (!%p1341_p12), %s361_s18, 8192, %s363_s20, [#allocation4], %s1547_s21, %s1547_s21, %s1548_s22  }
  0x1e   : > { %1519 = dma.done.wait (%p1351_p9), [#allocation4], 8192  }
  0x1f   : > { %1521 = vsyncadd (%p1351_p9), [#allocation4], 4294959104  ;;  %s1677_s27 = sshll.u32 %s1639_s8, 2  ;;  %s1955_s0 = sld [smem:[#allocation12_spill]]  ;;  %vm460_vm0 = vcmask 64512   ;;  %vm542_vm1 = vcmask 261120  }
  0x20   : > { %p441_p13 = scmp.lt.s32.totalorder %s1677_s27, 7  ;;  %s1956_s1 = sld [smem:[#allocation13_spill]]  ;;  %vm626_vm2 = vcmask 392192   ;;  %vm756_vm3 = vcmask 130112   ;;  %vm767_vm4 = vcmask 1041409   ;;  %vm769_vm5 = vcmask 1042434  }
  0x21   : > { %s1957_s3 = sld [smem:[#allocation15_spill]]  ;;  %vm771_vm6 = vcmask 1043459   ;;  %vm774_vm7 = vcmask 125952   ;;  %s1179_s18 = scalar_lea.hbm %s1946_s12, %s1677_s27 }
  0x22   : > { %s442_s29 = scalar_select %p441_p13, %s1677_s27, 7 }
  0x23   : > { %s1958_s2 = sld [smem:[#allocation14_spill]]  ;;  %s1183_s21 = sshll.u32 %s1179_s18, 4  ;;  %s1184_s21 = int_to_ptr.hbm [resolvable:$true] %s1183_s21 }
  0x24   : > { %s1330_s30 = sshll.u32 %s442_s29, 4  ;;  %s1959_s5 = sld [smem:[#allocation17_spill]] }
  0x25   : > { %s445_s19 = scalar_lea.vmem %s1955_s0, %s1330_s30  ;;  %s1960_s4 = sld [smem:[#allocation16_spill]] }
  0x26   : > { %v455_v1 = vld [vmem:[%s1956_s1] sm:$0xff]  ;;  %v448_v3 = vld [vmem:[%s445_s19 + $0x8] sm:$0xff]  ;;  %v449_v4 = vld [vmem:[%s445_s19 + $0x10] sm:$0xff] }
  0x27   : > { %v447_v2 = vld [vmem:[%s445_s19] sm:$0xff]  ;;  %500 = vmatpush.msra.mxu0 %v455_v1  ;;  %v450_v5 = vld [vmem:[%s445_s19 + $0x18] sm:$0xff]  ;;  %v452_v8 = vld [vmem:[%s445_s19 + $0x28] sm:$0xff] }
  0x28   : > { %1299 = vmatmul.msk.f32.vlgmr.msra.gmra.mxu0 %vm460_vm0, %v447_v2  ;;  %v537_v6 = vld [vmem:[%s1957_s3 + $0x18] sm:$0xff]  ;;  %v451_v7 = vld [vmem:[%s445_s19 + $0x20] sm:$0xff]  ;;  %v453_v9 = vld [vmem:[%s445_s19 + $0x30] sm:$0xff] }
  0x29   : > { %579 = vmatpush.msra.mxu1 %v537_v6  ;;  %v454_v10 = vld [vmem:[%s445_s19 + $0x38] sm:$0xff]  ;;  %v536_v11 = vld [vmem:[%s1957_s3 + $0x10] sm:$0xff]  ;;  %v535_v12 = vld [vmem:[%s1957_s3 + $0x8] sm:$0xff]  ;;  %s1856_s19 = sand.u32 1, %s1536_s24  }
  0x2a   : > { %v534_v13 = vld [vmem:[%s1957_s3] sm:$0xff]  ;;  %v621_v27 = vld [vmem:[%s1959_s5 + $0x28] sm:$0xff]  ;;  %v619_v29 = vld [vmem:[%s1959_s5 + $0x18] sm:$0xff]  ;;  %s1295_s29 = sshll.u32 %s1856_s19, 2  ;;  %s1154_s22 = scalar_lea.sflag [#allocation8], %s1856_s19 }
  0x2b   : > { %580 = vmatpush.msra.mxu1 %v536_v11  ;;  %v1393_v14 = vld [vmem:[%s1958_s2] ss:$0 sm:$0xff]  ;;  %661 = vmatpush.msra.mxu2 %v621_v27  ;;  %v618_v42 = vld [vmem:[%s1959_s5 + $0x10] sm:$0xff]  ;;  %v617_v43 = vld [vmem:[%s1959_s5 + $0x8] sm:$0xff]  ;;  %s439_s30 = scalar_lea.vmem [#allocation7], %s1295_s29  ;;  %s1460_s29 = sshra.s32 %s1184_s21, 4  ;;  %s1461_s29 = int_to_ptr.hbm [resolvable:$true] %s1460_s29 }
  0x2c   : > { %v620_v28 = vld [vmem:[%s1959_s5 + $0x20] sm:$0xff]  ;;  %s1181_s20 = sshll.u32 %s439_s30, 4  ;;  %s1462_s0 = scalar_lea.hbm %s1461_s29, 4  ;;  %s1182_s20 = int_to_ptr.vmem [resolvable:$true] %s1181_s20 }
  0x2d   : > { %581 = vmatpush.msra.mxu1 %v535_v12  ;;  %662 = vmatpush.msra.mxu2 %v620_v28  ;;  %v616_v44 = vld [vmem:[%s1959_s5] sm:$0xff]  ;;  %p1463_p0 = scmp.ne.s32.totalorder %s1461_s29, %s1462_s0  ;;  %s1466_s3 = scalar_lea.hbm %s1946_s12, 8 }
  0x2e   : > { %v1394_v45 = vld [vmem:[%s1960_s4] ss:$0 sm:$0xff]  ;;  %p1467_p3 = scmp.lt.s32.totalorder %s1461_s29, %s1946_s12  ;;  %p1468_p4 = scmp.lt.s32.totalorder %s1466_s3, %s1462_s0 }
  0x2f   : > { %582 = vmatpush.msra.mxu1 %v534_v13  ;;  %663 = vmatpush.msra.mxu2 %v619_v29  ;;  %v1395_v6 = vld [vmem:[%s1940_s6] ss:$0 sm:$0xff]  ;;  %p1464_p1 = pnand %p1463_p0, %p1656_p5 }
  0x30   : > { %1300 = vmatmul.msk.f32.gmra.mxu0 %vm460_vm0, %v448_v3  ;;  %p1469_p7 = por %p1468_p4, %p1467_p3 }
  0x31   : > { %664 = vmatpush.msra.mxu2 %v618_v42  ;;  %p1465_p2 = pneg %p1464_p1 }
  0x33   : > { %665 = vmatpush.msra.mxu2 %v617_v43  ;;  %p1470_p8 = pnand %p1469_p7, %p1465_p2 }
  0x35   : > { %666 = vmatpush.msra.mxu2 %v616_v44 }
  0x38   : > { %1301 = vmatmul.msk.f32.gmra.mxu0 %vm460_vm0, %v449_v4 }
  0x40   : > { %1302 = vmatmul.msk.f32.gmra.mxu0 %vm460_vm0, %v450_v5 }
  0x48   : > { %1303 = vmatmul.msk.f32.gmra.mxu0 %vm460_vm0, %v451_v7 }
  0x50   : > { %1304 = vmatmul.msk.f32.gmra.mxu0 %vm460_vm0, %v452_v8 }
  0x58   : > { %1305 = vmatmul.msk.f32.gmra.mxu0 %vm460_vm0, %v453_v9  ;;  %v1396_v9 = vld [vmem:[%s1941_s7] ss:$0 sm:$0xff] }
  0x60   : > { %1306 = vmatmul.msk.f32.gmra.mxu0 %vm460_vm0, %v454_v10  ;;  %v1549_v10 = vmov 0  }
  0x61   : > { %1390 = vset.pattern.permute.xlu0 %v1549_v10  ;;  %1392 = vset.pattern.permute.xlu1 %v1549_v10 }
  0x62   : > { %1391 = vset.pattern.permute.xlu2 %v1549_v10 }
  0xa5   : > { %v502_v15 = vpop.f32.mrf.mxu0 }
  0xa6   : > { %v503_v16 = vadd.f32 %v1393_v14, %v502_v15 }
  0xa8   : > { %v526_v17 = vmax.f32 %v503_v16, 0.0 }
  0xaa   : > { %1307 = vmatmul.msk.f32.vlgmr.msra.gmra.mxu1 %vm542_vm1, %v526_v17 }
  0xad   : > { %v505_v18 = vpop.f32.mrf.mxu0 }
  0xae   : > { %v506_v19 = vadd.f32 %v1393_v14, %v505_v18 }
  0xb0   : > { %v527_v20 = vmax.f32 %v506_v19, 0.0 }
  0xb2   : > { %1308 = vmatmul.msk.f32.gmra.mxu1 %vm542_vm1, %v527_v20 }
  0xb5   : > { %v508_v21 = vpop.f32.mrf.mxu0 }
  0xb6   : > { %v509_v22 = vadd.f32 %v1393_v14, %v508_v21 }
  0xb8   : > { %v528_v23 = vmax.f32 %v509_v22, 0.0 }
  0xba   : > { %1309 = vmatmul.msk.f32.gmra.mxu1 %vm542_vm1, %v528_v23 }
  0xbd   : > { %v511_v24 = vpop.f32.mrf.mxu0 }
  0xbe   : > { %v512_v25 = vadd.f32 %v1393_v14, %v511_v24 }
  0xc0   : > { %v529_v26 = vmax.f32 %v512_v25, 0.0  ;;  %v1397_v25 = vld [vmem:[#allocation2] ss:$0 sm:$0xff] }
  0xc2   : > { %1310 = vmatmul.msk.f32.gmra.mxu1 %vm542_vm1, %v529_v26 }
  0xc5   : > { %v514_v30 = vpop.f32.mrf.mxu0 }
  0xc6   : > { %v515_v31 = vadd.f32 %v1393_v14, %v514_v30 }
  0xc8   : > { %v530_v32 = vmax.f32 %v515_v31, 0.0 }
  0xca   : > { %1311 = vmatmul.msk.f32.gmra.mxu1 %vm542_vm1, %v530_v32 }
  0xcd   : > { %v517_v33 = vpop.f32.mrf.mxu0 }
  0xce   : > { %v518_v34 = vadd.f32 %v1393_v14, %v517_v33 }
  0xd0   : > { %v531_v35 = vmax.f32 %v518_v34, 0.0 }
  0xd2   : > { %1312 = vmatmul.msk.f32.gmra.mxu1 %vm542_vm1, %v531_v35 }
  0xd5   : > { %v520_v36 = vpop.f32.mrf.mxu0 }
  0xd6   : > { %v521_v37 = vadd.f32 %v1393_v14, %v520_v36 }
  0xd8   : > { %v532_v38 = vmax.f32 %v521_v37, 0.0 }
  0xda   : > { %1313 = vmatmul.msk.f32.gmra.mxu1 %vm542_vm1, %v532_v38 }
  0xdd   : > { %v523_v39 = vpop.f32.mrf.mxu0 }
  0xde   : > { %v524_v40 = vadd.f32 %v1393_v14, %v523_v39 }
  0xe0   : > { %v533_v41 = vmax.f32 %v524_v40, 0.0 }
  0xe2   : > { %1314 = vmatmul.msk.f32.gmra.mxu1 %vm542_vm1, %v533_v41 }
 0x127   : > { %v584_v46 = vpop.f32.mrf.mxu1 }
 0x128   : > { %v585_v47 = vadd.f32 %v1394_v45, %v584_v46  ;;  %v751_v46 = vlaneseq }
 0x12a   : > { %v608_v48 = vmax.f32 %v585_v47, 0.0 }
 0x12c   : > { %1315 = vmatmul.msk.f32.vlgmr.msra.gmra.mxu2 %vm626_vm2, %v608_v48  ;;  %v1793_v48 = vand.u32 127, %v751_v46 }
 0x12f   : > { %v587_v49 = vpop.f32.mrf.mxu1 }
 0x130   : > { %v588_v50 = vadd.f32 %v1394_v45, %v587_v49 }
 0x132   : > { %v609_v51 = vmax.f32 %v588_v50, 0.0 }
 0x134   : > { %1316 = vmatmul.msk.f32.gmra.mxu2 %vm626_vm2, %v609_v51  ;;  %v1796_v51 = vadd.s32 4294967288, %v1793_v48 }
 0x137   : > { %v590_v52 = vpop.f32.mrf.mxu1 }
 0x138   : > { %v591_v53 = vadd.f32 %v1394_v45, %v590_v52 }
 0x13a   : > { %v610_v54 = vmax.f32 %v591_v53, 0.0 }
 0x13c   : > { %1317 = vmatmul.msk.f32.gmra.mxu2 %vm626_vm2, %v610_v54 }
 0x13f   : > { %v593_v55 = vpop.f32.mrf.mxu1 }
 0x140   : > { %v594_v56 = vadd.f32 %v1394_v45, %v593_v55 }
 0x142   : > { %v611_v57 = vmax.f32 %v594_v56, 0.0 }
 0x144   : > { %1318 = vmatmul.msk.f32.gmra.mxu2 %vm626_vm2, %v611_v57 }
 0x147   : > { %v596_v58 = vpop.f32.mrf.mxu1 }
 0x148   : > { %v597_v59 = vadd.f32 %v1394_v45, %v596_v58 }
 0x14a   : > { %v612_v60 = vmax.f32 %v597_v59, 0.0 }
 0x14c   : > { %1319 = vmatmul.msk.f32.gmra.mxu2 %vm626_vm2, %v612_v60 }
 0x14f   : > { %v599_v61 = vpop.f32.mrf.mxu1 }
 0x150   : > { %v600_v62 = vadd.f32 %v1394_v45, %v599_v61 }
 0x152   : > { %v613_v63 = vmax.f32 %v600_v62, 0.0 }
 0x154   : > { %1320 = vmatmul.msk.f32.gmra.mxu2 %vm626_vm2, %v613_v63 }
 0x157   : > { %v602_v0 = vpop.f32.mrf.mxu1 }
 0x158   : > { %v603_v1 = vadd.f32 %v1394_v45, %v602_v0 }
 0x15a   : > { %v614_v2 = vmax.f32 %v603_v1, 0.0 }
 0x15c   : > { %1321 = vmatmul.msk.f32.gmra.mxu2 %vm626_vm2, %v614_v2 }
 0x15f   : > { %v605_v3 = vpop.f32.mrf.mxu1 }
 0x160   : > { %v606_v4 = vadd.f32 %v1394_v45, %v605_v3 }
 0x162   : > { %v615_v5 = vmax.f32 %v606_v4, 0.0 }
 0x164   : > { %1322 = vmatmul.msk.f32.gmra.mxu2 %vm626_vm2, %v615_v5 }
 0x1af   : > { %v668_v7 = vpop.f32.mrf.mxu2 }
 0x1b0   : > { %v1750_v8 = vadd.f32 %v1395_v6, %v668_v7 }
 0x1b2   : > { %v692_v11 = vmax.f32 %v1750_v8, 0.0  ;;  %v976_v8 = vld [vmem:[#allocation3 + $0x18] sm:$0xff] }
 0x1b4   : > { %v704_v12 = vmul.f32 %v1396_v9, %v692_v11 }
 0x1b6   : > { %712 = vadd.xlane.f32.xlu0 %v704_v12 }
 0x1b7   : > { %v671_v13 = vpop.f32.mrf.mxu2 }
 0x1b8   : > { %v1758_v14 = vadd.f32 %v1395_v6, %v671_v13 }
 0x1ba   : > { %v693_v15 = vmax.f32 %v1758_v14, 0.0  ;;  %v982_v14 = vld [vmem:[#allocation3 + $0x48] sm:$0xff] }
 0x1bc   : > { %v705_v16 = vmul.f32 %v1396_v9, %v693_v15 }
 0x1be   : > { %714 = vadd.xlane.f32.xlu0 %v705_v16 }
 0x1bf   : > { %v674_v17 = vpop.f32.mrf.mxu2 }
 0x1c0   : > { %v1763_v18 = vadd.f32 %v1395_v6, %v674_v17 }
 0x1c2   : > { %v694_v19 = vmax.f32 %v1763_v18, 0.0 }
 0x1c4   : > { %v706_v20 = vmul.f32 %v1396_v9, %v694_v19 }
 0x1c6   : > { %716 = vadd.xlane.f32.xlu1 %v706_v20 }
 0x1c7   : > { %v677_v21 = vpop.f32.mrf.mxu2 }
 0x1c8   : > { %v1768_v22 = vadd.f32 %v1395_v6, %v677_v21 }
 0x1ca   : > { %v695_v23 = vmax.f32 %v1768_v22, 0.0 }
 0x1cc   : > { %v707_v24 = vmul.f32 %v1396_v9, %v695_v23 }
 0x1ce   : > { %718 = vadd.xlane.f32.xlu1 %v707_v24 }
 0x1cf   : > { %v680_v26 = vpop.f32.mrf.mxu2 }
 0x1d0   : > { %v1773_v27 = vadd.f32 %v1395_v6, %v680_v26 }
 0x1d2   : > { %v696_v28 = vmax.f32 %v1773_v27, 0.0  ;;  %732 = vperm.xlu0 %1390, %v1397_v25  }
 0x1d4   : > { %v708_v29 = vmul.f32 %v1396_v9, %v696_v28 }
 0x1d6   : > { %720 = vadd.xlane.f32.xlu2 %v708_v29 }
 0x1d7   : > { %v683_v30 = vpop.f32.mrf.mxu2 }
 0x1d8   : > { %v1778_v31 = vadd.f32 %v1395_v6, %v683_v30 }
 0x1da   : > { %v697_v32 = vmax.f32 %v1778_v31, 0.0 }
 0x1dc   : > { %v709_v33 = vmul.f32 %v1396_v9, %v697_v32 }
 0x1de   : > { %722 = vadd.xlane.f32.xlu2 %v709_v33 }
 0x1df   : > { %v686_v34 = vpop.f32.mrf.mxu2 }
 0x1e0   : > { %v1783_v35 = vadd.f32 %v1395_v6, %v686_v34 }
 0x1e2   : > { %v698_v36 = vmax.f32 %v1783_v35, 0.0 }
 0x1e4   : > { %v710_v37 = vmul.f32 %v1396_v9, %v698_v36 }
 0x1e6   : > { %724 = vadd.xlane.f32.xlu1 %v710_v37 }
 0x1e7   : > { %v689_v38 = vpop.f32.mrf.mxu2 }
 0x1e8   : > { %v1788_v39 = vadd.f32 %v1395_v6, %v689_v38 }
 0x1ea   : > { %v699_v40 = vmax.f32 %v1788_v39, 0.0 }
 0x1ec   : > { %v711_v41 = vmul.f32 %v1396_v9, %v699_v40 }
 0x1ee   : > { %726 = vadd.xlane.f32.xlu2 %v711_v41 }
 0x229   : > { %v713_v42 = vpop.xlane.xlu0 %712 }
 0x231   : > { %v715_v45 = vpop.xlane.xlu0 %714 }
 0x239   : > { %v717_v43 = vpop.xlane.xlu1 %716 }
 0x241   : > { %v719_v47 = vpop.xlane.xlu1 %718 }
 0x244   : > { %v733_v49 = vpop.permute.xlu0 %732 }
 0x245   : > { %v735_v52 = vadd.f32 %v733_v49, %v713_v42  ;;  %v736_v53 = vadd.f32 %v733_v49, %v715_v45  ;;  %v737_v54 = vadd.f32 %v733_v49, %v717_v43  ;;  %v738_v55 = vadd.f32 %v733_v49, %v719_v47 }
 0x247   : > { %v753_v59 = vperm.slane %v735_v52, %v1793_v48  ;;  %v755_v60 = vperm.slane %v736_v53, %v1796_v51  ;;  %v758_v61 = vperm.slane %v737_v54, %v1793_v48  ;;  %v759_v62 = vperm.slane %v738_v55, %v1796_v51 }
 0x249   : > { %v721_v44 = vpop.xlane.xlu2 %720  ;;  %v757_v4 = vsel %vm756_vm3, %v755_v60, %v753_v59  ;;  %v760_v5 = vsel %vm756_vm3, %v759_v62, %v758_v61 }
 0x24a   : > { %v739_v57 = vadd.f32 %v733_v49, %v721_v44  ;;  %v768_v10 = vsel %vm767_vm4, %v760_v5, %v757_v4 }
 0x24c   : > { %v761_v1 = vperm.slane %v739_v57, %v1793_v48 }
 0x251   : > { %v723_v50 = vpop.xlane.xlu2 %722 }
 0x252   : > { %v740_v56 = vadd.f32 %v733_v49, %v723_v50 }
 0x254   : > { %v762_v63 = vperm.slane %v740_v56, %v1796_v51 }
 0x256   : > { %v763_v6 = vsel %vm756_vm3, %v762_v63, %v761_v1 }
 0x257   : > { %v770_v13 = vsel %vm769_vm5, %v763_v6, %v768_v10 }
 0x259   : > { %v725_v58 = vpop.xlane.xlu1 %724 }
 0x25a   : > { %v741_v0 = vadd.f32 %v733_v49, %v725_v58 }
 0x25c   : > { %v764_v7 = vperm.slane %v741_v0, %v1793_v48 }
 0x261   : > { %v727_v2 = vpop.xlane.xlu2 %726 }
 0x262   : > { %v742_v3 = vadd.f32 %v733_v49, %v727_v2 }
 0x264   : > { %v765_v9 = vperm.slane %v742_v3, %v1796_v51 }
 0x266   : > { %v766_v12 = vsel %vm756_vm3, %v765_v9, %v764_v7 }
 0x267   : > { %v772_v16 = vsel %vm771_vm6, %v766_v12, %v770_v13 }
 0x268   : > { %v775_v17 = vsel %vm774_vm7, %v772_v16, -inf }
 0x269   : > { %776 = vmax.xlane.f32.xlu1 %v775_v17 }
 0x2dc   : > { %v777_v20 = vpop.xlane.xlu1 %776 }
 0x2dd   : > { %v779_v21 = vperm.slane %v777_v20, 0  ;;  %v780_v24 = vperm.slane %v777_v20, 1  ;;  %v781_v30 = vperm.slane %v777_v20, 2  ;;  %v782_v37 = vperm.slane %v777_v20, 3 }
 0x2df   : > { %v787_v25 = vsub.f32 %v735_v52, %v779_v21  ;;  %v788_v26 = vsub.f32 %v736_v53, %v779_v21  ;;  %v790_v29 = vsub.f32 %v738_v55, %v780_v24  ;;  %v789_v41 = vsub.f32 %v737_v54, %v780_v24 }
 0x2e0   : > { %v792_v42 = vsub.f32 %v740_v56, %v781_v30  ;;  %v793_v43 = vsub.f32 %v741_v0, %v782_v37  ;;  %v791_v50 = vsub.f32 %v739_v57, %v781_v30  ;;  %v794_v56 = vsub.f32 %v742_v3, %v782_v37 }
 0x2e1   : > { %v795_v33 = vmul.f32 1.442695, %v787_v25  ;;  %v797_v34 = vmul.f32 1.442695, %v788_v26  ;;  %v801_v38 = vmul.f32 1.442695, %v790_v29 }
 0x2e2   : > { %v799_v44 = vmul.f32 1.442695, %v789_v41  ;;  %v805_v45 = vmul.f32 1.442695, %v792_v42  ;;  %v807_v49 = vmul.f32 1.442695, %v793_v43 }
 0x2e3   : > { %1398 = vpow2.f32 %v795_v33  ;;  %v803_v53 = vmul.f32 1.442695, %v791_v50  ;;  %v809_v59 = vmul.f32 1.442695, %v794_v56 }
 0x2e4   : > { %1400 = vpow2.f32 %v797_v34 }
 0x2e5   : > { %1402 = vpow2.f32 %v801_v38 }
 0x2e6   : > { %1404 = vpow2.f32 %v799_v44 }
 0x2e7   : > { %1406 = vpow2.f32 %v805_v45 }
 0x2e8   : > { %1408 = vpow2.f32 %v807_v49 }
 0x2e9   : > { %v1399_v46 = vpop.eup %1398  ;;  %1410 = vpow2.f32 %v803_v53 }
 0x2ea   : > { %v1401_v47 = vpop.eup %1400  ;;  %820 = vperm.xlu2 %1391, %v1399_v46   ;;  %1412 = vpow2.f32 %v809_v59 }
 0x2eb   : > { %823 = vperm.xlu1 %1392, %v1401_v47   ;;  %v1403_v52 = vpop.eup %1402 }
 0x2ec   : > { %829 = vperm.xlu0 %1390, %v1403_v52   ;;  %v1405_v54 = vpop.eup %1404 }
 0x2ed   : > { %v1407_v55 = vpop.eup %1406 }
 0x2ee   : > { %v1409_v58 = vpop.eup %1408 }
 0x2ef   : > { %v1411_v60 = vpop.eup %1410 }
 0x2f0   : > { %v1413_v57 = vpop.eup %1412 }
 0x2f2   : > { %826 = vperm.xlu2 %1391, %v1405_v54  }
 0x2f3   : > { %835 = vperm.xlu1 %1392, %v1407_v55  }
 0x2f4   : > { %838 = vperm.xlu0 %1390, %v1409_v58  }
 0x2fa   : > { %832 = vperm.xlu2 %1391, %v1411_v60  }
 0x302   : > { %841 = vperm.xlu2 %1391, %v1413_v57  }
 0x344   : > { %v821_v61 = vpop.permute.xlu2 %820 }
 0x345   : > { %v843_v3 = vperm.slane %v821_v61, %v1793_v48  ;;  %v1033_v61 = vld [vmem:[#allocation3 + $0x1e0] sm:$0xff] }
 0x346   : > { %1055 = vmatpush.msra.mxu3 %v1033_v61  ;;  %v995_v61 = vld [vmem:[#allocation3 + $0xb0] sm:$0xff] }
 0x34c   : > { %v827_v62 = vpop.permute.xlu2 %826 }
 0x34d   : > { %v846_v5 = vperm.slane %v827_v62, %v1793_v48  ;;  %v1025_v62 = vld [vmem:[#allocation3 + $0x1a0] sm:$0xff] }
 0x354   : > { %v833_v63 = vpop.permute.xlu2 %832 }
 0x355   : > { %v849_v12 = vperm.slane %v833_v63, %v1793_v48  ;;  %v1017_v63 = vld [vmem:[#allocation3 + $0x160] sm:$0xff] }
 0x35c   : > { %v842_v9 = vpop.permute.xlu2 %841 }
 0x35d   : > { %v824_v0 = vpop.permute.xlu1 %823  ;;  %v853_v17 = vperm.slane %v842_v9, %v1796_v51  ;;  %v1023_v9 = vld [vmem:[#allocation3 + $0x190] sm:$0xff] }
 0x35e   : > { %v830_v1 = vpop.permute.xlu0 %829  ;;  %v844_v4 = vperm.slane %v824_v0, %v1796_v51  ;;  %v1009_v0 = vld [vmem:[#allocation3 + $0x120] sm:$0xff] }
 0x35f   : > { %v847_v2 = vperm.slane %v830_v1, %v1796_v51  ;;  %v1005_v1 = vld [vmem:[#allocation3 + $0x100] sm:$0xff] }
 0x360   : > { %v845_v7 = vsel %vm756_vm3, %v844_v4, %v843_v3  ;;  %v997_v4 = vld [vmem:[#allocation3 + $0xc0] sm:$0xff] }
 0x361   : > { %v848_v6 = vsel %vm756_vm3, %v847_v2, %v846_v5  ;;  %v1001_v2 = vld [vmem:[#allocation3 + $0xe0] sm:$0xff] }
 0x362   : > { %v855_v24 = vsel %vm767_vm4, %v848_v6, %v845_v7  ;;  %v993_v3 = vld [vmem:[#allocation3 + $0xa0] sm:$0xff]  ;;  %v1027_v6 = vld [vmem:[#allocation3 + $0x1b0] sm:$0xff]  ;;  %v1024_v7 = vld [vmem:[#allocation3 + $0x198] sm:$0xff] }
 0x363   : > { %v989_v5 = vld [vmem:[#allocation3 + $0x80] sm:$0xff] }
 0x365   : > { %v836_v10 = vpop.permute.xlu1 %835 }
 0x366   : > { %v850_v13 = vperm.slane %v836_v10, %v1796_v51  ;;  %v839_v16 = vpop.permute.xlu0 %838  ;;  %v1020_v10 = vld [vmem:[#allocation3 + $0x178] sm:$0xff] }
 0x367   : > { %v852_v20 = vperm.slane %v839_v16, %v1793_v48  ;;  %v977_v16 = vld [vmem:[#allocation3 + $0x20] sm:$0xff] }
 0x368   : > { %v851_v21 = vsel %vm756_vm3, %v850_v13, %v849_v12  ;;  %v985_v12 = vld [vmem:[#allocation3 + $0x60] sm:$0xff] }
 0x369   : > { %v856_v25 = vsel %vm769_vm5, %v851_v21, %v855_v24  ;;  %v854_v26 = vsel %vm756_vm3, %v853_v17, %v852_v20  ;;  %v981_v13 = vld [vmem:[#allocation3 + $0x40] sm:$0xff]  ;;  %v1019_v21 = vld [vmem:[#allocation3 + $0x170] sm:$0xff]  ;;  %v1016_v24 = vld [vmem:[#allocation3 + $0x158] sm:$0xff] }
 0x36a   : > { %v857_v29 = vsel %vm771_vm6, %v854_v26, %v856_v25  ;;  %v973_v17 = vld [vmem:[#allocation3] sm:$0xff]  ;;  %v1015_v25 = vld [vmem:[#allocation3 + $0x150] sm:$0xff]  ;;  %v1012_v26 = vld [vmem:[#allocation3 + $0x138] sm:$0xff] }
 0x36b   : > { %v859_v30 = vsel %vm774_vm7, %v857_v29, 0.0  ;;  %v1034_v29 = vld [vmem:[#allocation3 + $0x1e8] sm:$0xff] }
 0x36c   : > { %860 = vadd.xlane.f32.xlu1 %v859_v30  ;;  %v1030_v30 = vld [vmem:[#allocation3 + $0x1c8] sm:$0xff] }
 0x3df   : > { %v861_v33 = vpop.xlane.xlu1 %860 }
 0x3e0   : > { %1414 = vrcp.f32 %v861_v33  ;;  %v1011_v33 = vld [vmem:[#allocation3 + $0x130] sm:$0xff] }
 0x3e6   : > { %v1415_v34 = vpop.eup %1414 }
 0x3e7   : > { %v864_v37 = vperm.slane %v1415_v34, 0  ;;  %v865_v42 = vperm.slane %v1415_v34, 1  ;;  %v866_v45 = vperm.slane %v1415_v34, 2  ;;  %v867_v53 = vperm.slane %v1415_v34, 3  ;;  %v1026_v34 = vld [vmem:[#allocation3 + $0x1a8] sm:$0xff] }
 0x3e9   : > { %v873_v38 = vmul.f32 %v1401_v47, %v864_v37  ;;  %v872_v41 = vmul.f32 %v1399_v46, %v864_v37  ;;  %v875_v43 = vmul.f32 %v1403_v52, %v865_v42  ;;  %v874_v44 = vmul.f32 %v1405_v54, %v865_v42  ;;  %v1029_v47 = vld [vmem:[#allocation3 + $0x1c0] sm:$0xff]  ;;  %v1036_v46 = vld [vmem:[#allocation3 + $0x1f8] sm:$0xff]  ;;  %v1035_v54 = vld [vmem:[#allocation3 + $0x1f0] sm:$0xff] }
 0x3ea   : > { %v877_v49 = vmul.f32 %v1407_v55, %v866_v45  ;;  %v876_v50 = vmul.f32 %v1411_v60, %v866_v45  ;;  %v879_v56 = vmul.f32 %v1413_v57, %v867_v53  ;;  %v878_v59 = vmul.f32 %v1409_v58, %v867_v53  ;;  %1115 = vmatpush.msrb.mxu1 %v1036_v46  ;;  %v1021_v52 = vld [vmem:[#allocation3 + $0x180] sm:$0xff]  ;;  %v1032_v55 = vld [vmem:[#allocation3 + $0x1d8] sm:$0xff]  ;;  %v1031_v60 = vld [vmem:[#allocation3 + $0x1d0] sm:$0xff] }
 0x3eb   : > { %892 = vperm.xlu2 %1391, %v873_v38   ;;  %889 = vperm.xlu0 %1390, %v872_v41   ;;  %v1013_v57 = vld [vmem:[#allocation3 + $0x140] sm:$0xff]  ;;  %v1028_v58 = vld [vmem:[#allocation3 + $0x1b8] sm:$0xff]  ;;  %v1007_v38 = vld [vmem:[#allocation3 + $0x110] sm:$0xff] }
 0x3ec   : > { %1056 = vmatpush.msra.mxu3 %v1029_v47  ;;  %1095 = vmatpush.msrb.mxu0 %v1035_v54  ;;  %v1008_v37 = vld [vmem:[#allocation3 + $0x118] sm:$0xff]  ;;  %v1022_v41 = vld [vmem:[#allocation3 + $0x188] sm:$0xff] }
 0x3ed   : > { %1116 = vmatpush.msrb.mxu1 %v1032_v55  ;;  %v1004_v42 = vld [vmem:[#allocation3 + $0xf8] sm:$0xff]  ;;  %v1014_v53 = vld [vmem:[#allocation3 + $0x148] sm:$0xff] }
 0x3ee   : > { %1057 = vmatpush.msra.mxu3 %v1025_v62  ;;  %1096 = vmatpush.msrb.mxu0 %v1031_v60  ;;  %v996_v47 = vld [vmem:[#allocation3 + $0xb8] sm:$0xff]  ;;  %v1006_v46 = vld [vmem:[#allocation3 + $0x108] sm:$0xff]  ;;  %v991_v62 = vld [vmem:[#allocation3 + $0x90] sm:$0xff] }
 0x3ef   : > { %1117 = vmatpush.msrb.mxu1 %v1028_v58  ;;  %v1002_v54 = vld [vmem:[#allocation3 + $0xe8] sm:$0xff]  ;;  %v988_v55 = vld [vmem:[#allocation3 + $0x78] sm:$0xff]  ;;  %v983_v60 = vld [vmem:[#allocation3 + $0x50] sm:$0xff] }
 0x3f0   : > { %1058 = vmatpush.msra.mxu3 %v1021_v52  ;;  %1097 = vmatpush.msrb.mxu0 %v1027_v6  ;;  %v992_v52 = vld [vmem:[#allocation3 + $0x98] sm:$0xff]  ;;  %v994_v6 = vld [vmem:[#allocation3 + $0xa8] sm:$0xff] }
 0x3f1   : > { %1118 = vmatpush.msrb.mxu1 %v1024_v7 }
 0x3f2   : > { %1059 = vmatpush.msra.mxu3 %v1017_v63  ;;  %1098 = vmatpush.msrb.mxu0 %v1023_v9  ;;  %v987_v63 = vld [vmem:[#allocation3 + $0x70] sm:$0xff] }
 0x3f3   : > { %898 = vperm.xlu2 %1391, %v875_v43   ;;  %895 = vperm.xlu0 %1390, %v874_v44   ;;  %v1003_v43 = vld [vmem:[#allocation3 + $0xf0] sm:$0xff]  ;;  %v1018_v44 = vld [vmem:[#allocation3 + $0x168] sm:$0xff] }
 0x3f4   : > { %1060 = vmatpush.msra.mxu3 %v1013_v57  ;;  %1119 = vmatpush.msrb.mxu1 %v1020_v10  ;;  %v984_v57 = vld [vmem:[#allocation3 + $0x58] sm:$0xff] }
 0x3f5   : > { %1099 = vmatpush.msrb.mxu0 %v1019_v21 }
 0x3f6   : > { %1061 = vmatpush.msra.mxu3 %v1009_v0  ;;  %1120 = vmatpush.msrb.mxu1 %v1016_v24  ;;  %v998_v0 = vld [vmem:[#allocation3 + $0xc8] sm:$0xff] }
 0x3f7   : > { %1100 = vmatpush.msrb.mxu0 %v1015_v25 }
 0x3f8   : > { %1062 = vmatpush.msra.mxu3 %v1005_v1  ;;  %1121 = vmatpush.msrb.mxu1 %v1012_v26 }
 0x3f9   : > { %1101 = vmatpush.msrb.mxu0 %v1011_v33 }
 0x3fa   : > { %1063 = vmatpush.msra.mxu3 %v1001_v2  ;;  %1122 = vmatpush.msrb.mxu1 %v1008_v37 }
 0x3fb   : > { %904 = vperm.xlu2 %1391, %v877_v49   ;;  %901 = vperm.xlu0 %1390, %v876_v50   ;;  %v1000_v50 = vld [vmem:[#allocation3 + $0xd8] sm:$0xff] }
 0x3fc   : > { %1064 = vmatpush.msra.mxu3 %v997_v4  ;;  %1102 = vmatpush.msrb.mxu0 %v1007_v38 }
 0x3fd   : > { %1123 = vmatpush.msrb.mxu1 %v1004_v42 }
 0x3fe   : > { %1065 = vmatpush.msra.mxu3 %v993_v3  ;;  %1103 = vmatpush.msrb.mxu0 %v1003_v43  ;;  %v979_v3 = vld [vmem:[#allocation3 + $0x30] sm:$0xff] }
 0x3ff   : > { %1124 = vmatpush.msrb.mxu1 %v1000_v50 }
 0x400   : > { %1066 = vmatpush.msra.mxu3 %v989_v5  ;;  %v980_v5 = vld [vmem:[#allocation3 + $0x38] sm:$0xff] }
 0x401   : > { %1125 = vmatpush.msrb.mxu1 %v996_v47 }
 0x402   : > { %1067 = vmatpush.msra.mxu3 %v985_v12 }
 0x403   : > { %910 = vperm.xlu2 %1391, %v879_v56   ;;  %907 = vperm.xlu0 %1390, %v878_v59   ;;  %v999_v56 = vld [vmem:[#allocation3 + $0xd0] sm:$0xff]  ;;  %v1010_v59 = vld [vmem:[#allocation3 + $0x128] sm:$0xff] }
 0x404   : > { %1068 = vmatpush.msra.mxu3 %v981_v13  ;;  %1104 = vmatpush.msrb.mxu0 %v999_v56 }
 0x405   : > { %1126 = vmatpush.msrb.mxu1 %v992_v52 }
 0x406   : > { %1069 = vmatpush.msra.mxu3 %v977_v16  ;;  %1105 = vmatpush.msrb.mxu0 %v995_v61 }
 0x407   : > { %1127 = vmatpush.msrb.mxu1 %v988_v55 }
 0x408   : > { %1070 = vmatpush.msra.mxu3 %v973_v17  ;;  %1106 = vmatpush.msrb.mxu0 %v991_v62  ;;  %v978_v17 = vld [vmem:[#allocation3 + $0x28] sm:$0xff] }
 0x409   : > { %1128 = vmatpush.msrb.mxu1 %v984_v57 }
 0x40a   : > { %1075 = vmatpush.msrb.mxu3 %v1034_v29  ;;  %1107 = vmatpush.msrb.mxu0 %v987_v63 }
 0x40b   : > { %1129 = vmatpush.msrb.mxu1 %v980_v5 }
 0x40c   : > { %1076 = vmatpush.msrb.mxu3 %v1030_v30  ;;  %1108 = vmatpush.msrb.mxu0 %v983_v60  ;;  %v974_v30 = vld [vmem:[#allocation3 + $0x8] sm:$0xff] }
 0x40d   : > { %1130 = vmatpush.msrb.mxu1 %v976_v8 }
 0x40e   : > { %1077 = vmatpush.msrb.mxu3 %v1026_v34  ;;  %1109 = vmatpush.msrb.mxu0 %v979_v3 }
 0x410   : > { %1078 = vmatpush.msrb.mxu3 %v1022_v41 }
 0x412   : > { %1079 = vmatpush.msrb.mxu3 %v1018_v44 }
 0x414   : > { %1080 = vmatpush.msrb.mxu3 %v1014_v53 }
 0x416   : > { %1081 = vmatpush.msrb.mxu3 %v1010_v59 }
 0x418   : > { %1082 = vmatpush.msrb.mxu3 %v1006_v46 }
 0x41a   : > { %1083 = vmatpush.msrb.mxu3 %v1002_v54 }
 0x41c   : > { %1084 = vmatpush.msrb.mxu3 %v998_v0 }
 0x41e   : > { %1085 = vmatpush.msrb.mxu3 %v994_v6 }
 0x445   : > { %v1830_v20 = vpop.permute.xlu2 %892 }
 0x446   : > { %v938_v7 = vmul.f32 %v1830_v20, %v693_v15  ;;  %v913_v33 = vperm.slane %v1830_v20, %v1796_v51 }
 0x44d   : > { %v1834_v49 = vpop.permute.xlu2 %898 }
 0x44e   : > { %v940_v1 = vmul.f32 %v1834_v49, %v695_v23  ;;  %v975_v23 = vld [vmem:[#allocation3 + $0x10] sm:$0xff]  ;;  %v916_v27 = vperm.slane %v1834_v49, %v1796_v51 }
 0x44f   : > { %1110 = vmatpush.msrb.mxu0 %v975_v23 }
 0x455   : > { %v905_v22 = vpop.permute.xlu2 %904 }
 0x456   : > { %v942_v15 = vmul.f32 %v905_v22, %v697_v32  ;;  %v919_v34 = vperm.slane %v905_v22, %v1796_v51 }
 0x45d   : > { %v1832_v45 = vpop.permute.xlu0 %889 }
 0x45e   : > { %v937_v2 = vmul.f32 %v1832_v45, %v692_v11  ;;  %v990_v11 = vld [vmem:[#allocation3 + $0x88] sm:$0xff]  ;;  %v912_v26 = vperm.slane %v1832_v45, %v1793_v48 }
 0x45f   : > { %1086 = vmatpush.msrb.mxu3 %v990_v11 }
 0x460   : > { %v945_v18 = vadd.f32 %v938_v7, %v937_v2  ;;  %v914_v44 = vsel %vm756_vm3, %v913_v33, %v912_v26 }
 0x462   : > { %v946_v13 = vrot.slane %v945_v18, 4 }
 0x464   : > { %v947_v31 = vadd.f32 %v946_v13, %v945_v18 }
 0x465   : > { %v896_v58 = vpop.permute.xlu0 %895 }
 0x466   : > { %v939_v4 = vmul.f32 %v896_v58, %v694_v19  ;;  %v986_v19 = vld [vmem:[#allocation3 + $0x68] sm:$0xff]  ;;  %v915_v21 = vperm.slane %v896_v58, %v1793_v48  ;;  %v948_v50 = vrot.slane %v947_v31, 2 }
 0x467   : > { %1087 = vmatpush.msrb.mxu3 %v986_v19 }
 0x468   : > { %v952_v9 = vadd.f32 %v940_v1, %v939_v4  ;;  %v917_v37 = vsel %vm756_vm3, %v916_v27, %v915_v21  ;;  %v949_v62 = vadd.f32 %v948_v50, %v947_v31 }
 0x469   : > { %1088 = vmatpush.msrb.mxu3 %v982_v14  ;;  %v924_v59 = vsel %vm767_vm4, %v917_v37, %v914_v44 }
 0x46a   : > { %v953_v10 = vrot.slane %v952_v9, 4 }
 0x46b   : > { %1089 = vmatpush.msrb.mxu3 %v978_v17 }
 0x46c   : > { %v954_v24 = vadd.f32 %v953_v10, %v952_v9 }
 0x46d   : > { %v902_v12 = vpop.permute.xlu0 %901  ;;  %1090 = vmatpush.msrb.mxu3 %v974_v30 }
 0x46e   : > { %v941_v16 = vmul.f32 %v902_v12, %v696_v28  ;;  %v918_v29 = vperm.slane %v902_v12, %v1793_v48  ;;  %v911_v28 = vpop.permute.xlu2 %910  ;;  %v955_v38 = vrot.slane %v954_v24, 2 }
 0x46f   : > { %v922_v42 = vperm.slane %v911_v28, %v1796_v51  ;;  %v944_v43 = vmul.f32 %v911_v28, %v699_v40 }
 0x470   : > { %v959_v25 = vadd.f32 %v942_v15, %v941_v16  ;;  %v920_v45 = vsel %vm756_vm3, %v919_v34, %v918_v29  ;;  %v956_v61 = vadd.f32 %v955_v38, %v954_v24 }
 0x471   : > { %v925_v51 = vsel %vm769_vm5, %v920_v45, %v924_v59 }
 0x472   : > { %v960_v32 = vrot.slane %v959_v25, 4 }
 0x474   : > { %v961_v41 = vadd.f32 %v960_v32, %v959_v25 }
 0x475   : > { %v908_v49 = vpop.permute.xlu0 %907 }
 0x476   : > { %v962_v20 = vrot.slane %v961_v41, 2  ;;  %v921_v53 = vperm.slane %v908_v49, %v1793_v48  ;;  %v943_v56 = vmul.f32 %v908_v49, %v698_v36  ;;  %v957_v48 = vrot.slane %v956_v61, 1 }
 0x477   : > { %v950_v36 = vrot.slane %v949_v62, 1 }
 0x478   : > { %v923_v39 = vsel %vm756_vm3, %v922_v42, %v921_v53  ;;  %v966_v40 = vadd.f32 %v944_v43, %v943_v56  ;;  %v963_v47 = vadd.f32 %v962_v20, %v961_v41  ;;  %v958_v55 = vadd.f32 %v957_v48, %v956_v61 }
 0x479   : > { %v926_v46 = vsel %vm771_vm6, %v923_v39, %v925_v51  ;;  %v951_v58 = vadd.f32 %v950_v36, %v949_v62 }
 0x47a   : > { %v967_v52 = vrot.slane %v966_v40, 4  ;;  %928 = vst.msk [vmem:[%s439_s30] sm:$0xf] %vm774_vm7, %v926_v46  ;;  %v964_v35 = vrot.slane %v963_v47, 1 }
 0x47b   : > { %v1051_v2 = vsel %vm767_vm4, %v958_v55, %v951_v58 }
 0x47c   : > { %v968_v54 = vadd.f32 %v967_v52, %v966_v40  ;;  %v965_v57 = vadd.f32 %v964_v35, %v963_v47 }
 0x47e   : > { %v969_v63 = vrot.slane %v968_v54, 2  ;;  %v1052_v4 = vsel %vm769_vm5, %v965_v57, %v1051_v2 }
 0x480   : > { %v970_v60 = vadd.f32 %v969_v63, %v968_v54 }
 0x482   : > { %v971_v0 = vrot.slane %v970_v60, 1 }
 0x484   : > { %v972_v1 = vadd.f32 %v971_v0, %v970_v60 }
 0x486   : > { %v1053_v3 = vsel %vm771_vm6, %v972_v1, %v1052_v4 }
 0x487   : > { %1071 = vmatmul.f32.vlgmr.msra.gmra.mxu3 %v1053_v3  ;;  %1111 = vmatmul.f32.vlgmr.msrb.gmra.mxu0 %v1053_v3 }
 0x488   : > { %1131 = vmatmul.f32.vlgmr.msrb.gmra.mxu1 %v1053_v3 }
 0x48f   : > { %1091 = vmatmul.f32.vlgmr.msrb.gmra.mxu3 %v1053_v3 }
 0x490   : > { %1473 = shalt.err (!%p1470_p8)
}
 0x491   : > { %1337 = dma.vmem_to_hbm [thread:$0]  (%p1656_p5), %s1182_s20, 64, %s1184_s21, %s1154_s22   ;;  %v1037_v5 = vld [vmem:[%s1944_s10] sm:$0xf]  ;;  %vm1141_vm8 = vcmask 1043456  }
 0x492   : > { %v1042_v6 = vperm.slane %v1037_v5, 3  ;;  %v1041_v7 = vperm.slane %v1037_v5, 2  ;;  %s1294_s1 = sshll.u32 %s1856_s19, 4  ;;  %s1331_s2 = sshll.u32 %s1639_s8, 4  ;;  %v1040_v10 = vperm.slane %v1037_v5, 1  ;;  %v1039_v12 = vperm.slane %v1037_v5, 0 }
 0x493   : > { %s432_s0 = scalar_lea.vmem [#allocation6], %s1294_s1  ;;  %s1165_s5 = scalar_lea.hbm %s1945_s11, %s1331_s2 }
 0x494   : > { %s1167_s16 = sshll.u32 %s432_s0, 4  ;;  %s1169_s17 = sshll.u32 %s1165_s5, 4  ;;  %s1168_s16 = int_to_ptr.vmem [resolvable:$true] %s1167_s16  ;;  %s1170_s17 = int_to_ptr.hbm [resolvable:$true] %s1169_s17 }
 0x495   : > { %s1149_s18 = scalar_lea.sflag [#allocation5], %s1856_s19  ;;  %s1488_s8 = sshra.s32 %s1170_s17, 4  ;;  %s1489_s8 = int_to_ptr.hbm [resolvable:$true] %s1488_s8 }
 0x496   : > { %s1490_s20 = scalar_lea.hbm %s1489_s8, 16  ;;  %s1494_s29 = scalar_lea.hbm %s1945_s11, 32 }
 0x497   : > { %p1491_p9 = scmp.ne.s32.totalorder %s1489_s8, %s1490_s20  ;;  %p1495_p12 = scmp.lt.s32.totalorder %s1489_s8, %s1945_s11 }
 0x498   : > { %p1496_p13 = scmp.lt.s32.totalorder %s1494_s29, %s1490_s20 }
 0x499   : > { %p1492_p10 = pnand %p1491_p9, %p1656_p5 }
 0x49a   : > { %p1497_p0 = por %p1496_p13, %p1495_p12 }
 0x49b   : > { %p1493_p11 = pneg %p1492_p10 }
 0x49d   : > { %p1498_p1 = pnand %p1497_p0, %p1493_p11 }
 0x504   : > { %v1112_v22 = vpop.f32.mrf.mxu0 }
 0x505   : > { %v1132_v9 = vpop.f32.mrf.mxu1  ;;  %v1113_v8 = vadd.f32 %v1112_v22, %v1041_v7 }
 0x506   : > { %v1133_v23 = vadd.f32 %v1132_v9, %v1042_v6 }
 0x508   : > { %v1140_v11 = vrot.slane %v1133_v23, 4 }
 0x50a   : > { %v1143_v18 = vsel %vm1141_vm8, %v1113_v8, %v1140_v11  ;;  %v1072_v19 = vpop.f32.mrf.mxu3 }
 0x50b   : > { %1147 = vst [vmem:[%s432_s0 + $0x8] sm:$0xff] %v1143_v18  ;;  %v1073_v13 = vadd.f32 %v1072_v19, %v1039_v12 }
 0x512   : > { %v1092_v14 = vpop.f32.mrf.mxu3 }
 0x513   : > { %v1093_v15 = vadd.f32 %v1092_v14, %v1040_v10 }
 0x515   : > { %v1139_v16 = vrot.slane %v1093_v15, 4 }
 0x517   : > { %v1142_v17 = vsel %vm1141_vm8, %v1073_v13, %v1139_v16 }
 0x518   : > { %1146 = vst [vmem:[%s432_s0] sm:$0xff] %v1142_v17 }
 0x519   : > { %1501 = shalt.err (!%p1498_p1)
}
 0x51a   : > { %1336 = dma.vmem_to_hbm [thread:$0]  (%p1656_p5), %s1168_s16, 256, %s1170_s17, %s1149_s18  }
 0x51b PF: > { %p1353_p2 = scmp.ge.s32.totalorder %s1544_s26, 2  ;;  %s1195_s19 = sand.u32 1, %s1532_s23  }
 0x51c   : > { %s1196_s1 = scalar_lea.sflag [#allocation5], %s1195_s19 }
 0x51d   : > { %p1345_p3 = pnand %p1353_p2, %p1660_p6 }
 0x51f   : > { %p1346_p4 = pneg %p1345_p3 }
 0x521   : > { %1523 = dma.done.wait (%p1346_p4), %s1196_s1, 256  }
 0x522   : > { %1525 = vsyncadd (%p1346_p4), %s1196_s1, 4294967040  ;;  %s1206_s0 = scalar_lea.sflag [#allocation8], %s1195_s19 }
 0x523   : > { %1527 = dma.done.wait (%p1346_p4), %s1206_s0, 64  }
 0x524   : > { %1529 = vsyncadd (%p1346_p4), %s1206_s0, 4294967232  ;;  %p29_p5 = scmp.ge.s32.totalorder %s1643_s28, 4   ;;  %s1961_s23 = smov %s1536_s24 }
 0x525   : > { %s1962_s24 = smov %s1540_s25  ;;  %s1963_s25 = smov %s1654_s13 }
 0x526   : > { %s1964_s26 = smov %s1643_s28  ;;  %31 = sbr.rel (!%p29_p5) target bundleno = 13 (0xd), region = 121 }
 0x52b   :  { %1212 = vsyncpa [#allocation4], 1 }
 0x52c   :  { %1214 = vsyncpa [#allocation4 + $0x1], 1 }
 0x52d   :  { %1215 = vsyncpa [#allocation5], 1 }
 0x52e   :  { %1217 = vsyncpa [#allocation5 + $0x1], 1 }
 0x52f   :  { %1218 = vsyncpa [#allocation8], 1 }
 0x530   :  { %1220 = vsyncpa [#allocation8 + $0x1], 1 }

</bundles_post_ra>
